<compile_context>
chip_gen: v7x
topology: tpu7x:2x2x1
jax: 0.10.0
libtpu: 0.0.40
codegen_flags: <defaults>
</compile_context>

<pallas_src>
from functools import partial

import jax
import jax.numpy as jnp
from jax import lax
from jax.experimental import pallas as pl
from jax.experimental.pallas import tpu as pltpu

EPS = 1e-5                                # nn.BatchNorm2d default
VMEM_LIMIT_BYTES = 32 * 1024 * 1024       # raise v5e's 16 MiB scoped default; safe on v6e/v7x
FUSED_VMEM_BUDGET = 8 * 1024 * 1024       # resident-footprint cap for the single-call fast path
TILED_VMEM_WORKSET = 20 * 1024 * 1024     # per-grid-step working-set cap for the tiled path


# ---------------------------------------------------------------------------
# Fast path: ONE pallas_call, whole problem VMEM-resident (small NHW)
# ---------------------------------------------------------------------------
def _fused_small(patches, w_mat, gamma2, beta2, N, Cin, Cout, H, W, out_dtype):
    HW = H * W
    NHW = N * HW
    inv_n = 1.0 / NHW
    # Write NCHW directly when H*W is lane-dense (multiple of 128); otherwise
    # fall back to flat NHWC rows + one XLA transpose outside.
    nchw_direct = (HW % 128 == 0)

    def kernel(patch_ref, w_ref, g_ref, b_ref, o_ref, acc_ref):
        # Conv as ONE (NHW, 9*Cin) @ (9*Cin, Cout) MXU matmul, f32 accumulation.
        acc_ref[...] = jnp.dot(patch_ref[...], w_ref[...],
                               preferred_element_type=jnp.float32)
        acc = acc_ref[...]
        # Batch stats (biased var).  Conv bias dropped: it cancels under BN.
        mean = jnp.sum(acc, axis=0, keepdims=True) * inv_n
        var = jnp.sum(acc * acc, axis=0, keepdims=True) * inv_n - mean * mean
        scale = g_ref[...] * lax.rsqrt(var + EPS)        # EUP rsqrt, in-kernel
        shift = b_ref[...] - mean * scale
        if nchw_direct:
            # Per-image (HW, Cout) -> (Cout, HW) via XLU transpose; the XLA side
            # then only does a free reshape to (N, Cout, H, W).
            for n in range(N):
                y = acc_ref[n * HW:(n + 1) * HW, :] * scale + shift
                o_ref[n] = y.T.astype(o_ref.dtype)
        else:
            o_ref[...] = (acc * scale + shift).astype(o_ref.dtype)

    if nchw_direct:
        out_shape = jax.ShapeDtypeStruct((N, Cout, HW), out_dtype)
        out_spec = pl.BlockSpec((N, Cout, HW), lambda i: (0, 0, 0))
    else:
        out_shape = jax.ShapeDtypeStruct((NHW, Cout), out_dtype)
        out_spec = pl.BlockSpec((NHW, Cout), lambda i: (0, 0))

    out = pl.pallas_call(
        kernel,
        out_shape=out_shape,
        grid=(1,),
        in_specs=[
            pl.BlockSpec((NHW, 9 * Cin), lambda i: (0, 0)),
            pl.BlockSpec((9 * Cin, Cout), lambda i: (0, 0)),
            pl.BlockSpec((1, Cout), lambda i: (0, 0)),
            pl.BlockSpec((1, Cout), lambda i: (0, 0)),
        ],
        out_specs=out_spec,
        scratch_shapes=[pltpu.VMEM((NHW, Cout), jnp.float32)],
        compiler_params=pltpu.CompilerParams(
            dimension_semantics=("arbitrary",),
            vmem_limit_bytes=VMEM_LIMIT_BYTES),
    )(patches, w_mat, gamma2, beta2)

    if nchw_direct:
        return out.reshape(N, Cout, H, W)
    return jnp.transpose(out.reshape(N, H, W, Cout), (0, 3, 1, 2))


# ---------------------------------------------------------------------------
# Tiled path: pass 1 = stats only, pass 2 = recompute conv + apply folded BN
# ---------------------------------------------------------------------------
def _pick_tile_rows(nhw, cin, cout, cdt_size):
    """Largest of 1024/512/256 that still yields >=2 tiles (keeps both v7x
    TensorCores busy under dimension_semantics=('parallel',)); shrink if the
    per-step double-buffered working set would crowd the scoped VMEM limit."""
    tile = 128
    for t in (1024, 512, 256):
        if nhw >= 2 * t:
            tile = t
            break
    while tile > 128 and tile * (2 * 9 * cin * cdt_size + 16 * cout) > TILED_VMEM_WORKSET:
        tile //= 2
    return tile


def _tiled_large(patches, w_mat, gamma2, beta2, N, Cin, Cout, H, W,
                 out_dtype, compute_dtype):
    NHW = N * H * W
    cdt_size = jnp.dtype(compute_dtype).itemsize
    tile_r = _pick_tile_rows(NHW, Cin, Cout, cdt_size)
    n_tiles = pl.cdiv(NHW, tile_r)
    nhw_pad = n_tiles * tile_r
    if nhw_pad != NHW:
        # Zero rows contribute exactly 0 to sum/sumsq (conv bias is dropped);
        # the fold below divides by the true NHW and padded rows are sliced off.
        patches = jnp.pad(patches, ((0, nhw_pad - NHW), (0, 0)))

    # ---- pass 1: per-tile partial BN stats (no f32 conv output written to HBM)
    # Stats stay tiny 3-D (n_tiles, 1, Cout): second-minor block dim == full
    # array dim keeps the layout trivially legal; the buffers are negligible.
    def stats_kernel(p_ref, w_ref, s_ref, ss_ref):
        acc = jnp.dot(p_ref[...], w_ref[...], preferred_element_type=jnp.float32)
        s_ref[...] = jnp.sum(acc, axis=0, keepdims=True)[None]
        ss_ref[...] = jnp.sum(acc * acc, axis=0, keepdims=True)[None]

    psum, psumsq = pl.pallas_call(
        stats_kernel,
        out_shape=(jax.ShapeDtypeStruct((n_tiles, 1, Cout), jnp.float32),
                   jax.ShapeDtypeStruct((n_tiles, 1, Cout), jnp.float32)),
        grid=(n_tiles,),
        in_specs=[pl.BlockSpec((tile_r, 9 * Cin), lambda i: (i, 0)),
                  pl.BlockSpec((9 * Cin, Cout), lambda i: (0, 0))],
        out_specs=(pl.BlockSpec((1, 1, Cout), lambda i: (i, 0, 0)),
                   pl.BlockSpec((1, 1, Cout), lambda i: (i, 0, 0))),
        compiler_params=pltpu.CompilerParams(
            dimension_semantics=("parallel",),
            vmem_limit_bytes=VMEM_LIMIT_BYTES),
    )(patches, w_mat)

    # ---- tiny per-channel fold (2*Cout floats of XLA work, f32).
    # NOTE: E[x^2]-mean^2 can cancel when |mean| >> std; fine for this forward
    # BN, revisit (Chan's parallel-variance formula) if it ever feeds training.
    mean = jnp.sum(psum, axis=0)[0] / NHW                 # (Cout,)
    var = jnp.sum(psumsq, axis=0)[0] / NHW - mean * mean  # biased variance
    scale = gamma2 * lax.rsqrt(var + EPS)                 # (1, Cout)
    shift = beta2 - mean * scale                          # (1, Cout)

    # ---- pass 2: RE-compute the K=36 GEMM (cheap, HBM-bound kernel) and apply
    # folded BN; transpose each tile in-kernel (XLU) -> lane-dense (Cout, NHW).
    def apply_kernel(p_ref, w_ref, sc_ref, sh_ref, o_ref):
        acc = jnp.dot(p_ref[...], w_ref[...], preferred_element_type=jnp.float32)
        y = acc * sc_ref[...] + sh_ref[...]
        o_ref[...] = y.T.astype(o_ref.dtype)

    out_t = pl.pallas_call(
        apply_kernel,
        out_shape=jax.ShapeDtypeStruct((Cout, nhw_pad), out_dtype),
        grid=(n_tiles,),
        in_specs=[pl.BlockSpec((tile_r, 9 * Cin), lambda i: (i, 0)),
                  pl.BlockSpec((9 * Cin, Cout), lambda i: (0, 0)),
                  pl.BlockSpec((1, Cout), lambda i: (0, 0)),
                  pl.BlockSpec((1, Cout), lambda i: (0, 0))],
        out_specs=pl.BlockSpec((Cout, tile_r), lambda i: (0, i)),
        compiler_params=pltpu.CompilerParams(
            dimension_semantics=("parallel",),
            vmem_limit_bytes=VMEM_LIMIT_BYTES),
    )(patches, w_mat, scale, shift)

    # (Cout, NHW) -> NCHW: contiguous leading-axis permute (free when N == 1).
    # In a real network, keep NHWC / (C, NHW) end-to-end instead.
    return jnp.transpose(out_t[:, :NHW].reshape(Cout, N, H, W), (1, 0, 2, 3))


# ---------------------------------------------------------------------------
# Public wrapper: FuseGFFConvBlock45.forward
# ---------------------------------------------------------------------------
@partial(jax.jit, static_argnames=("compute_dtype", "force_tiled"))
def fuse_gff_conv_block45(x_nchw, w_oihw, bias, gamma, beta, *,
                          compute_dtype=jnp.bfloat16, force_tiled=False):
    """Conv2d(3x3, s=1, p=1) + BatchNorm2d (training-mode batch statistics).

    x_nchw: (N, Cin, H, W) -> (N, Cout, H, W).
    compute_dtype: MXU operand dtype (bf16 default on all generations; v7x's MXU
    has no int path and bf16 halves patch/weight HBM reads).  Accumulation and
    all BN / elementwise math are f32 regardless; bf16 operands slightly perturb
    the batch statistics themselves (acceptable for BN, documented here).
    """
    # Conv bias cancels exactly under training-mode BN (the batch mean absorbs
    # it).  If eval-mode / running-stats BN is ever added, reinstate the bias.
    del bias
    N, Cin, H, W = x_nchw.shape
    Cout = w_oihw.shape[0]
    NHW = N * H * W

    # ---- XLA glue: NCHW -> NHWC, cast to compute dtype BEFORE pad/concat so the
    # im2col patches materialize at compute-dtype width, then im2col.
    x_nhwc = jnp.transpose(x_nchw, (0, 2, 3, 1)).astype(compute_dtype)
    xp = jnp.pad(x_nhwc, ((0, 0), (1, 1), (1, 1), (0, 0)))
    patches = jnp.concatenate(
        [xp[:, kh:kh + H, kw:kw + W, :] for kh in range(3) for kw in range(3)],
        axis=-1).reshape(NHW, 9 * Cin)
    # OIHW -> ((kh*3+kw)*Cin + cin, Cout), matching the patch layout above.
    w_mat = jnp.transpose(w_oihw, (2, 3, 1, 0)).reshape(9 * Cin, Cout).astype(compute_dtype)
    gamma2 = gamma.reshape(1, Cout).astype(jnp.float32)
    beta2 = beta.reshape(1, Cout).astype(jnp.float32)

    fused_bytes = (NHW * Cout * 4 * 5
                   + NHW * 9 * Cin * jnp.dtype(compute_dtype).itemsize)
    if (not force_tiled) and N <= 64 and fused_bytes <= FUSED_VMEM_BUDGET:
        return _fused_small(patches, w_mat, gamma2, beta2,
                            N, Cin, Cout, H, W, x_nchw.dtype)
    return _tiled_large(patches, w_mat, gamma2, beta2,
                        N, Cin, Cout, H, W, x_nchw.dtype, compute_dtype)


def reference(x_nchw, w_oihw, bias, gamma, beta):
    """Pure-JAX reference (lax conv + training-mode BN), f32 throughout."""
    y = lax.conv_general_dilated(
        x_nchw.astype(jnp.float32), w_oihw.astype(jnp.float32),
        window_strides=(1, 1), padding=((1, 1), (1, 1)),
        dimension_numbers=("NCHW", "OIHW", "NCHW"),
    ) + bias.reshape(1, -1, 1, 1)
    mean = jnp.mean(y, axis=(0, 2, 3), keepdims=True)
    var = jnp.mean((y - mean) ** 2, axis=(0, 2, 3), keepdims=True)
    yn = (y - mean) * lax.rsqrt(var + EPS)
    return yn * gamma.reshape(1, -1, 1, 1) + beta.reshape(1, -1, 1, 1)


if __name__ == "__main__":
    # FuseGFFConvBlock45(inputs=4, n_filters=128, kernel_size=3, stride=1, padding=1)
    N, Cin, H, W = 2, 4, 16, 16
    Cout = 128

    key = jax.random.PRNGKey(0)
    kx, kw, kb, kg, kbeta = jax.random.split(key, 5)
    x = jax.random.normal(kx, (N, Cin, H, W), jnp.float32)
    conv_w = jax.random.normal(kw, (Cout, Cin, 3, 3), jnp.float32) * 0.1
    conv_b = jax.random.normal(kb, (Cout,), jnp.float32) * 0.1
    bn_gamma = 1.0 + 0.1 * jax.random.normal(kg, (Cout,), jnp.float32)
    bn_beta = 0.1 * jax.random.normal(kbeta, (Cout,), jnp.float32)

    ref = jax.block_until_ready(reference(x, conv_w, conv_b, bn_gamma, bn_beta))

    # 1) Default (bf16 MXU operands, fused single-call fast path): loose tolerance
    #    is the expected bf16 operand-rounding noise (also perturbs batch stats).
    out = jax.block_until_ready(
        fuse_gff_conv_block45(x, conv_w, conv_b, bn_gamma, bn_beta))
    assert out.shape == (N, Cout, H, W), out.shape
    assert jnp.allclose(out, ref, atol=1e-1, rtol=1e-1), \
        float(jnp.max(jnp.abs(out - ref)))

    # 2) f32 MXU operands, fused fast path: tight match to PyTorch semantics.
    out_f32 = jax.block_until_ready(
        fuse_gff_conv_block45(x, conv_w, conv_b, bn_gamma, bn_beta,
                              compute_dtype=jnp.float32))
    assert jnp.allclose(out_f32, ref, atol=2e-4, rtol=2e-4), \
        float(jnp.max(jnp.abs(out_f32 - ref)))

    # 3) Force the tiled two-pass (large-NHW) path to validate it as well
    #    (at this size it uses 2 x 256-row tiles, exercising the stats reduction).
    out_tiled = jax.block_until_ready(
        fuse_gff_conv_block45(x, conv_w, conv_b, bn_gamma, bn_beta,
                              compute_dtype=jnp.float32, force_tiled=True))
    assert out_tiled.shape == (N, Cout, H, W), out_tiled.shape
    assert jnp.allclose(out_tiled, ref, atol=2e-4, rtol=2e-4), \
        float(jnp.max(jnp.abs(out_tiled - ref)))

    print("KERNEL_OK")
</pallas_src>

<mosaic_0001>
module attributes {stable_mosaic.version = 11 : i64} {
  func.func @kernel(%arg0: i32, %arg1: memref<512x36xbf16, #tpu.memory_space<vmem>>, %arg2: memref<36x128xbf16, #tpu.memory_space<vmem>>, %arg3: memref<1x128xf32, #tpu.memory_space<vmem>>, %arg4: memref<1x128xf32, #tpu.memory_space<vmem>>, %arg5: memref<2x128x256xf32, #tpu.memory_space<vmem>>, %arg6: memref<512x128xf32, #tpu.memory_space<vmem>>) attributes {dimension_semantics = [#tpu.dimension_semantics<arbitrary>], iteration_bounds = array<i64: 1>, scalar_prefetch = 0 : i64, scratch_operands = 1 : i64, tpu.core_type = #tpu.core_type<tc>, window_params = [{pipeline_mode = #tpu.pipeline_mode<synchronous>, transform_indices = @transform_0, window_bounds = array<i64: 512, 36>}, {pipeline_mode = #tpu.pipeline_mode<synchronous>, transform_indices = @transform_1, window_bounds = array<i64: 36, 128>}, {pipeline_mode = #tpu.pipeline_mode<synchronous>, transform_indices = @transform_2, window_bounds = array<i64: 1, 128>}, {pipeline_mode = #tpu.pipeline_mode<synchronous>, transform_indices = @transform_3, window_bounds = array<i64: 1, 128>}, {pipeline_mode = #tpu.pipeline_mode<synchronous>, transform_indices = @transform_4, window_bounds = array<i64: 2, 128, 256>}]} {
    %c0 = arith.constant 0 : index
    %c0_0 = arith.constant 0 : index
    %0 = vector.load %arg1[%c0, %c0_0] : memref<512x36xbf16, #tpu.memory_space<vmem>>, vector<512x36xbf16>
    %c0_1 = arith.constant 0 : index
    %c0_2 = arith.constant 0 : index
    %1 = vector.load %arg2[%c0_1, %c0_2] : memref<36x128xbf16, #tpu.memory_space<vmem>>, vector<36x128xbf16>
    %cst = arith.constant dense<0.000000e+00> : vector<512x128xf32>
    %2 = tpu.matmul %0, %1, %cst {dimension_numbers = #tpu.dot_dimension_numbers<[1], [0], [0], [1], [0, 0, 1, 1], [], []>} : vector<512x36xbf16>, vector<36x128xbf16>, vector<512x128xf32> -> vector<512x128xf32>
    %c0_3 = arith.constant 0 : index
    %c0_4 = arith.constant 0 : index
    %3 = vector.load %arg6[%c0_3, %c0_4] : memref<512x128xf32, #tpu.memory_space<vmem>>, vector<512x128xf32>
    tpu.vector_store %arg6[%c0_3, %c0_4], %2 {strides = array<i32>} : memref<512x128xf32, #tpu.memory_space<vmem>>, vector<512x128xf32>,
    %c0_5 = arith.constant 0 : index
    %c0_6 = arith.constant 0 : index
    %4 = vector.load %arg6[%c0_5, %c0_6] : memref<512x128xf32, #tpu.memory_space<vmem>>, vector<512x128xf32>
    %cst_7 = arith.constant dense<0.000000e+00> : vector<128xf32>
    %5 = vector.multi_reduction <add>, %4, %cst_7 [0] : vector<512x128xf32> to vector<128xf32>
    %6 = vector.shape_cast %5 : vector<128xf32> to vector<1x128xf32>
    %cst_8 = arith.constant 0.001953125 : f32
    %7 = vector.broadcast %cst_8 : f32 to vector<1x128xf32>
    %8 = arith.mulf %6, %7 : vector<1x128xf32>
    %9 = arith.mulf %4, %4 : vector<512x128xf32>
    %cst_9 = arith.constant dense<0.000000e+00> : vector<128xf32>
    %10 = vector.multi_reduction <add>, %9, %cst_9 [0] : vector<512x128xf32> to vector<128xf32>
    %11 = vector.shape_cast %10 : vector<128xf32> to vector<1x128xf32>
    %cst_10 = arith.constant 0.001953125 : f32
    %12 = vector.broadcast %cst_10 : f32 to vector<1x128xf32>
    %13 = arith.mulf %11, %12 : vector<1x128xf32>
    %14 = arith.mulf %8, %8 : vector<1x128xf32>
    %15 = arith.subf %13, %14 : vector<1x128xf32>
    %c0_11 = arith.constant 0 : index
    %c0_12 = arith.constant 0 : index
    %16 = vector.load %arg3[%c0_11, %c0_12] : memref<1x128xf32, #tpu.memory_space<vmem>>, vector<1x128xf32>
    %cst_13 = arith.constant 9.99999974E-6 : f32
    %17 = vector.broadcast %cst_13 : f32 to vector<1x128xf32>
    %18 = arith.addf %15, %17 : vector<1x128xf32>
    %19 = math.rsqrt %18 : vector<1x128xf32>
    %20 = arith.mulf %16, %19 : vector<1x128xf32>
    %c0_14 = arith.constant 0 : index
    %c0_15 = arith.constant 0 : index
    %21 = vector.load %arg4[%c0_14, %c0_15] : memref<1x128xf32, #tpu.memory_space<vmem>>, vector<1x128xf32>
    %22 = arith.mulf %8, %20 : vector<1x128xf32>
    %23 = arith.subf %21, %22 : vector<1x128xf32>
    %c0_16 = arith.constant 0 : index
    %c0_17 = arith.constant 0 : index
    %24 = vector.load %arg6[%c0_16, %c0_17] : memref<512x128xf32, #tpu.memory_space<vmem>>, vector<256x128xf32>
    %25 = vector.broadcast %20 : vector<1x128xf32> to vector<256x128xf32>
    %26 = arith.mulf %24, %25 : vector<256x128xf32>
    %27 = vector.broadcast %23 : vector<1x128xf32> to vector<256x128xf32>
    %28 = arith.addf %26, %27 : vector<256x128xf32>
    %29 = tpu.transpose %28, [1, 0] : vector<256x128xf32> -> vector<128x256xf32>
    %c0_18 = arith.constant 0 : index
    %c0_19 = arith.constant 0 : index
    %c0_20 = arith.constant 0 : index
    %30 = vector.load %arg5[%c0_18, %c0_19, %c0_20] : memref<2x128x256xf32, #tpu.memory_space<vmem>>, vector<1x128x256xf32>
    %31 = vector.shape_cast %30 : vector<1x128x256xf32> to vector<128x256xf32>
    %32 = vector.shape_cast %29 : vector<128x256xf32> to vector<1x128x256xf32>
    tpu.vector_store %arg5[%c0_18, %c0_19, %c0_20], %32 {strides = array<i32>} : memref<2x128x256xf32, #tpu.memory_space<vmem>>, vector<1x128x256xf32>,
    %c256 = arith.constant 256 : index
    %c0_21 = arith.constant 0 : index
    %33 = vector.load %arg6[%c256, %c0_21] : memref<512x128xf32, #tpu.memory_space<vmem>>, vector<256x128xf32>
    %34 = vector.broadcast %20 : vector<1x128xf32> to vector<256x128xf32>
    %35 = arith.mulf %33, %34 : vector<256x128xf32>
    %36 = vector.broadcast %23 : vector<1x128xf32> to vector<256x128xf32>
    %37 = arith.addf %35, %36 : vector<256x128xf32>
    %38 = tpu.transpose %37, [1, 0] : vector<256x128xf32> -> vector<128x256xf32>
    %c1 = arith.constant 1 : index
    %c0_22 = arith.constant 0 : index
    %c0_23 = arith.constant 0 : index
    %39 = vector.load %arg5[%c1, %c0_22, %c0_23] : memref<2x128x256xf32, #tpu.memory_space<vmem>>, vector<1x128x256xf32>
    %40 = vector.shape_cast %39 : vector<1x128x256xf32> to vector<128x256xf32>
    %41 = vector.shape_cast %38 : vector<128x256xf32> to vector<1x128x256xf32>
    tpu.vector_store %arg5[%c1, %c0_22, %c0_23], %41 {strides = array<i32>} : memref<2x128x256xf32, #tpu.memory_space<vmem>>, vector<1x128x256xf32>,
    return
  }
  func.func @transform_0(%arg0: i32) -> (i32, i32) {
    %c0_i32 = arith.constant 0 : i32
    %c0_i32_0 = arith.constant 0 : i32
    %c0_i32_1 = arith.constant 0 : i32
    return %c0_i32, %c0_i32_0 : i32, i32
  }
  func.func @transform_1(%arg0: i32) -> (i32, i32) {
    %c0_i32 = arith.constant 0 : i32
    %c0_i32_0 = arith.constant 0 : i32
    %c0_i32_1 = arith.constant 0 : i32
    return %c0_i32, %c0_i32_0 : i32, i32
  }
  func.func @transform_2(%arg0: i32) -> (i32, i32) {
    %c0_i32 = arith.constant 0 : i32
    %c0_i32_0 = arith.constant 0 : i32
    %c0_i32_1 = arith.constant 0 : i32
    return %c0_i32, %c0_i32_0 : i32, i32
  }
  func.func @transform_3(%arg0: i32) -> (i32, i32) {
    %c0_i32 = arith.constant 0 : i32
    %c0_i32_0 = arith.constant 0 : i32
    %c0_i32_1 = arith.constant 0 : i32
    return %c0_i32, %c0_i32_0 : i32, i32
  }
  func.func @transform_4(%arg0: i32) -> (i32, i32, i32) {
    %c0_i32 = arith.constant 0 : i32
    %c0_i32_0 = arith.constant 0 : i32
    %c0_i32_1 = arith.constant 0 : i32
    %c0_i32_2 = arith.constant 0 : i32
    return %c0_i32, %c0_i32_0, %c0_i32_1 : i32, i32, i32
  }
}

</mosaic_0001>

<bundles_post_ra>
// kernel: fuse_gff_conv_block45.1
= control target key start
LH: loop header
LB: loop body
LE: loop exit
PB: predicated region body
PF: predicated region fallthrough
CT: control target
= control target key end

     0   :  { %vm262_vm0 = vcmask 293888   ;;  %vm359_vm1 = vcmask 1041408   ;;  %s2657_s1 = inlined_call_operand.vmem [shape: bf16[36,128], index: 1, kind: input, shape index: {}]   ;;  %s2658_s0 = inlined_call_operand.vmem [shape: bf16[512,36], index: 0, kind: input, shape index: {}]   ;;  %s2659_s2 = inlined_call_operand.vmem [shape: f32[1,128], index: 2, kind: input, shape index: {}]   ;;  %s2660_s3 = inlined_call_operand.vmem [shape: f32[1,128], index: 3, kind: input, shape index: {}]   ;;  %s2661_s4 = inlined_call_operand.vmem [shape: f32[2,128,256], index: 4, kind: output, shape index: {}]  }
   0x1   :  { %v1606_v0 = vld [vmem:[%s2657_s1] sm:$0xff]   ;;  %v1607_v1 = vld [vmem:[%s2657_s1 + $0x8] sm:$0xff]   ;;  %v1608_v2 = vld [vmem:[%s2657_s1 + $0x10] ss:$0 sps:$4 sm:$0x33]  }
   0x2   :  { %1528 = vmatprep.subr.bf16.mxu0 %v1606_v0  ;;  %v1609_v3 = vld [vmem:[%s2658_s0] sm:$0xff]   ;;  %1598 = vmatprep.subr.bf16.mxu1 %v1606_v0  ;;  %v361_v4 = vsel %vm359_vm1, %v1608_v2, 0  ;;  %v1610_v5 = vld [vmem:[%s2658_s0 + $0x8] sm:$0xff]   ;;  %v1611_v6 = vld [vmem:[%s2658_s0 + $0x10] sm:$0xff]  }
   0x3   :  { %1529 = vmatpush3.bf16.msra.mxu0 %v1606_v0  ;;  %1601 = vmatpush3.bf16.msra.mxu1 %v1606_v0  ;;  %v1612_v7 = vld [vmem:[%s2658_s0 + $0x18] sm:$0xff]   ;;  %v1613_v8 = vld [vmem:[%s2658_s0 + $0x20] sm:$0xff]   ;;  %v1626_v10 = vld [vmem:[%s2658_s0 + $0x88] sm:$0xff]  }
   0x4   :  { %1530 = vmatprep.subr.bf16.mxu0 %v1607_v1  ;;  %1534 = vmatprep.mubr.msk.bf16.mxu0 %vm262_vm0, %v1609_v3  ;;  %v1625_v9 = vld [vmem:[%s2658_s0 + $0x80] sm:$0xff]   ;;  %v1627_v11 = vld [vmem:[%s2658_s0 + $0x90] sm:$0xff]   ;;  %v1614_v12 = vld [vmem:[%s2658_s0 + $0x28] sm:$0xff]  }
   0x5   :  { %1599 = vmatprep.subr.bf16.mxu1 %v1607_v1  ;;  %1566 = vmatprep.mubr.msk.bf16.mxu1 %vm262_vm0, %v1625_v9  ;;  %v1615_v13 = vld [vmem:[%s2658_s0 + $0x30] sm:$0xff]   ;;  %v1628_v14 = vld [vmem:[%s2658_s0 + $0x98] sm:$0xff]   ;;  %v1629_v15 = vld [vmem:[%s2658_s0 + $0xa0] sm:$0xff]  }
   0x6   :  { %v1616_v16 = vld [vmem:[%s2658_s0 + $0x38] sm:$0xff]   ;;  %v1630_v17 = vld [vmem:[%s2658_s0 + $0xa8] sm:$0xff]   ;;  %v1617_v18 = vld [vmem:[%s2658_s0 + $0x40] sm:$0xff]  }
   0x7   :  { %1531 = vmatpush3.bf16.msra.mxu0 %v1607_v1  ;;  %1602 = vmatpush3.bf16.msra.mxu1 %v1607_v1  ;;  %v1631_v19 = vld [vmem:[%s2658_s0 + $0xb0] sm:$0xff]   ;;  %v1618_v20 = vld [vmem:[%s2658_s0 + $0x48] sm:$0xff]   ;;  %v1632_v21 = vld [vmem:[%s2658_s0 + $0xb8] sm:$0xff]  }
   0x8   :  { %1604 = vmatprep.subr.msk.bf16.mxu0 %vm359_vm1, %v1608_v2  ;;  %1605 = vmatprep.subr.msk.bf16.mxu1 %vm359_vm1, %v1608_v2  ;;  %v1619_v22 = vld [vmem:[%s2658_s0 + $0x50] sm:$0xff]   ;;  %v1633_v23 = vld [vmem:[%s2658_s0 + $0xc0] sm:$0xff]   ;;  %v1620_v24 = vld [vmem:[%s2658_s0 + $0x58] sm:$0xff]  }
   0x9   :  { %v1634_v25 = vld [vmem:[%s2658_s0 + $0xc8] sm:$0xff]   ;;  %v1621_v26 = vld [vmem:[%s2658_s0 + $0x60] sm:$0xff]   ;;  %v1635_v27 = vld [vmem:[%s2658_s0 + $0xd0] sm:$0xff]  }
   0xa   :  { %v1622_v28 = vld [vmem:[%s2658_s0 + $0x68] sm:$0xff]   ;;  %v1636_v29 = vld [vmem:[%s2658_s0 + $0xd8] sm:$0xff]   ;;  %v1623_v30 = vld [vmem:[%s2658_s0 + $0x70] sm:$0xff]  }
   0xb   :  { %1533 = vmatpush3.bf16.msra.mxu0 %v361_v4  ;;  %1603 = vmatpush3.bf16.msra.mxu1 %v361_v4  ;;  %v1637_v31 = vld [vmem:[%s2658_s0 + $0xe0] sm:$0xff]   ;;  %v1624_v32 = vld [vmem:[%s2658_s0 + $0x78] sm:$0xff]   ;;  %v1638_v33 = vld [vmem:[%s2658_s0 + $0xe8] sm:$0xff]  }
   0xc   :  { %v1639_v34 = vld [vmem:[%s2658_s0 + $0xf0] sm:$0xff]   ;;  %v1640_v35 = vld [vmem:[%s2658_s0 + $0xf8] sm:$0xff]  }
   0xe   :  { %1535 = vmatmul.mubr.msk.bf16.vlgmr.msra.gmra.mrb[0].mxu0 %vm262_vm0, %v1610_v5  ;;  %1567 = vmatmul.mubr.msk.bf16.vlgmr.msra.gmra.mrb[0].mxu1 %vm262_vm0, %v1626_v10 }
   0xf   :  { %1538 = vmatprep.mubr.msk.bf16.mxu0 %vm262_vm0, %v1611_v6  ;;  %1570 = vmatprep.mubr.msk.bf16.mxu1 %vm262_vm0, %v1627_v11 }
  0x16   :  { %1539 = vmatmul.mubr.msk.bf16.gmra.mrb[4].mxu0 %vm262_vm0, %v1612_v7  ;;  %1571 = vmatmul.mubr.msk.bf16.gmra.mrb[4].mxu1 %vm262_vm0, %v1628_v14 }
  0x17   :  { %1542 = vmatprep.mubr.msk.bf16.mxu0 %vm262_vm0, %v1613_v8  ;;  %1574 = vmatprep.mubr.msk.bf16.mxu1 %vm262_vm0, %v1629_v15 }
  0x1e   :  { %1543 = vmatmul.mubr.msk.bf16.gmra.mrb[8].mxu0 %vm262_vm0, %v1614_v12  ;;  %1575 = vmatmul.mubr.msk.bf16.gmra.mrb[8].mxu1 %vm262_vm0, %v1630_v17 }
  0x1f   :  { %1546 = vmatprep.mubr.msk.bf16.mxu0 %vm262_vm0, %v1615_v13  ;;  %1578 = vmatprep.mubr.msk.bf16.mxu1 %vm262_vm0, %v1631_v19 }
  0x26   :  { %1547 = vmatmul.mubr.msk.bf16.gmra.mrb[12].mxu0 %vm262_vm0, %v1616_v16  ;;  %1579 = vmatmul.mubr.msk.bf16.gmra.mrb[12].mxu1 %vm262_vm0, %v1632_v21 }
  0x27   :  { %1550 = vmatprep.mubr.msk.bf16.mxu0 %vm262_vm0, %v1617_v18  ;;  %1582 = vmatprep.mubr.msk.bf16.mxu1 %vm262_vm0, %v1633_v23 }
  0x2e   :  { %1551 = vmatmul.mubr.msk.bf16.gmra.mrb[16].mxu0 %vm262_vm0, %v1618_v20  ;;  %1583 = vmatmul.mubr.msk.bf16.gmra.mrb[16].mxu1 %vm262_vm0, %v1634_v25 }
  0x2f   :  { %1554 = vmatprep.mubr.msk.bf16.mxu0 %vm262_vm0, %v1619_v22  ;;  %1586 = vmatprep.mubr.msk.bf16.mxu1 %vm262_vm0, %v1635_v27 }
  0x36   :  { %1555 = vmatmul.mubr.msk.bf16.gmra.mrb[20].mxu0 %vm262_vm0, %v1620_v24  ;;  %1587 = vmatmul.mubr.msk.bf16.gmra.mrb[20].mxu1 %vm262_vm0, %v1636_v29 }
  0x37   :  { %1558 = vmatprep.mubr.msk.bf16.mxu0 %vm262_vm0, %v1621_v26  ;;  %1590 = vmatprep.mubr.msk.bf16.mxu1 %vm262_vm0, %v1637_v31 }
  0x3e   :  { %1559 = vmatmul.mubr.msk.bf16.gmra.mrb[24].mxu0 %vm262_vm0, %v1622_v28  ;;  %1591 = vmatmul.mubr.msk.bf16.gmra.mrb[24].mxu1 %vm262_vm0, %v1638_v33 }
  0x3f   :  { %1562 = vmatprep.mubr.msk.bf16.mxu0 %vm262_vm0, %v1623_v30  ;;  %1594 = vmatprep.mubr.msk.bf16.mxu1 %vm262_vm0, %v1639_v34 }
  0x46   :  { %1563 = vmatmul.mubr.msk.bf16.gmra.mrb[28].mxu0 %vm262_vm0, %v1624_v32  ;;  %1595 = vmatmul.mubr.msk.bf16.gmra.mrb[28].mxu1 %vm262_vm0, %v1640_v35 }
  0xe1   :  { %v1805_v36 = vpop.f32.mrb[0].mxu0  ;;  %v1827_v50 = vpop.f32.mrb[0].mxu1 }
  0xe2   :  { %v1807_v37 = vpop.f32.mrb[1].mxu0  ;;  %v852_v43 = vmul.f32 %v1805_v36, %v1805_v36  ;;  %v1831_v52 = vpop.f32.mrb[1].mxu1 }
  0xe3   :  { %v1809_v38 = vpop.f32.mrb[2].mxu0  ;;  %v850_v40 = vmul.f32 %v1807_v37, %v1807_v37  ;;  %2688 = vst [vmem:[#allocation5_spill] sm:$0xff] %v1831_v52  ;;  %v1838_v57 = vpop.f32.mrb[2].mxu1 }
  0xe4   :  { %v1811_v39 = vpop.f32.mrb[3].mxu0  ;;  %v853_v46 = vmul.f32 %v1809_v38, %v1809_v38  ;;  %v1842_v59 = vpop.f32.mrb[3].mxu1 }
  0xe5   :  { %v780_v41 = vadd.f32 %v1811_v39, %v1807_v37  ;;  %v851_v42 = vmul.f32 %v1811_v39, %v1811_v39 }
  0xe7   :  { %v781_v44 = vadd.f32 %v1805_v36, %v780_v41  ;;  %v914_v45 = vadd.f32 %v851_v42, %v850_v40 }
  0xe9   :  { %v915_v47 = vadd.f32 %v914_v45, %v852_v43  ;;  %v1824_v48 = vpop.f32.mrb[4].mxu0  ;;  %v782_v49 = vadd.f32 %v1809_v38, %v781_v44  ;;  %v1855_v6 = vpop.f32.mrb[4].mxu1 }
  0xea   :  { %2686 = vst [vmem:[#allocation3_spill] sm:$0xff] %v1824_v48  ;;  %v1829_v51 = vpop.f32.mrb[5].mxu0  ;;  %v856_v63 = vmul.f32 %v1824_v48, %v1824_v48  ;;  %v1859_v8 = vpop.f32.mrb[5].mxu1 }
  0xeb   :  { %2687 = vst [vmem:[#allocation4_spill] sm:$0xff] %v1829_v51  ;;  %v783_v53 = vadd.f32 %v782_v49, %v1829_v51  ;;  %v854_v54 = vmul.f32 %v1829_v51, %v1829_v51  ;;  %v916_v55 = vadd.f32 %v915_v47, %v853_v46  ;;  %v1836_v56 = vpop.f32.mrb[6].mxu0  ;;  %v1866_v13 = vpop.f32.mrb[6].mxu1 }
  0xec   :  { %2689 = vst [vmem:[#allocation6_spill] sm:$0xff] %v1836_v56  ;;  %v1840_v58 = vpop.f32.mrb[7].mxu0  ;;  %v857_v2 = vmul.f32 %v1836_v56, %v1836_v56  ;;  %v1870_v15 = vpop.f32.mrb[7].mxu1 }
  0xed   :  { %2690 = vst [vmem:[#allocation7_spill] sm:$0xff] %v1840_v58  ;;  %v917_v60 = vadd.f32 %v916_v55, %v854_v54  ;;  %v784_v61 = vadd.f32 %v783_v53, %v1840_v58  ;;  %v855_v62 = vmul.f32 %v1840_v58, %v1840_v58 }
  0xef   :  { %v785_v0 = vadd.f32 %v1824_v48, %v784_v61  ;;  %v918_v1 = vadd.f32 %v917_v60, %v855_v62 }
  0xf1   :  { %v919_v3 = vadd.f32 %v918_v1, %v856_v63  ;;  %v1852_v4 = vpop.f32.mrb[8].mxu0  ;;  %v786_v5 = vadd.f32 %v1836_v56, %v785_v0  ;;  %v1883_v26 = vpop.f32.mrb[8].mxu1 }
  0xf2   :  { %2691 = vst [vmem:[#allocation8_spill] sm:$0xff] %v1852_v4  ;;  %v1857_v7 = vpop.f32.mrb[9].mxu0  ;;  %v860_v19 = vmul.f32 %v1852_v4, %v1852_v4  ;;  %v1887_v28 = vpop.f32.mrb[9].mxu1 }
  0xf3   :  { %2692 = vst [vmem:[#allocation9_spill] sm:$0xff] %v1857_v7  ;;  %v787_v9 = vadd.f32 %v786_v5, %v1857_v7  ;;  %v858_v10 = vmul.f32 %v1857_v7, %v1857_v7  ;;  %v920_v11 = vadd.f32 %v919_v3, %v857_v2  ;;  %v1864_v12 = vpop.f32.mrb[10].mxu0  ;;  %v1894_v33 = vpop.f32.mrb[10].mxu1  ;;  %v887_v7 = vmul.f32 %v1870_v15, %v1870_v15 }
  0xf4   :  { %2693 = vst [vmem:[#allocation10_spill] sm:$0xff] %v1864_v12  ;;  %v1868_v14 = vpop.f32.mrb[11].mxu0  ;;  %v861_v22 = vmul.f32 %v1864_v12, %v1864_v12  ;;  %v1898_v35 = vpop.f32.mrb[11].mxu1 }
  0xf5   :  { %2694 = vst [vmem:[#allocation11_spill] sm:$0xff] %v1868_v14  ;;  %v921_v16 = vadd.f32 %v920_v11, %v858_v10  ;;  %v788_v17 = vadd.f32 %v787_v9, %v1868_v14  ;;  %v859_v18 = vmul.f32 %v1868_v14, %v1868_v14 }
  0xf7   :  { %v789_v20 = vadd.f32 %v1852_v4, %v788_v17  ;;  %v922_v21 = vadd.f32 %v921_v16, %v859_v18 }
  0xf9   :  { %v923_v23 = vadd.f32 %v922_v21, %v860_v19  ;;  %v1880_v24 = vpop.f32.mrb[12].mxu0  ;;  %v790_v25 = vadd.f32 %v1864_v12, %v789_v20  ;;  %v1911_v54 = vpop.f32.mrb[12].mxu1 }
  0xfa   :  { %2695 = vst [vmem:[#allocation12_spill] sm:$0xff] %v1880_v24  ;;  %v1885_v27 = vpop.f32.mrb[13].mxu0  ;;  %v864_v43 = vmul.f32 %v1880_v24, %v1880_v24  ;;  %v1915_v60 = vpop.f32.mrb[13].mxu1 }
  0xfb   :  { %2696 = vst [vmem:[#allocation13_spill] sm:$0xff] %v1885_v27  ;;  %v791_v29 = vadd.f32 %v790_v25, %v1885_v27  ;;  %v862_v30 = vmul.f32 %v1885_v27, %v1885_v27  ;;  %v924_v31 = vadd.f32 %v923_v23, %v861_v22  ;;  %v1892_v32 = vpop.f32.mrb[14].mxu0  ;;  %v1922_v1 = vpop.f32.mrb[14].mxu1 }
  0xfc   :  { %2697 = vst [vmem:[#allocation14_spill] sm:$0xff] %v1892_v32  ;;  %v1896_v34 = vpop.f32.mrb[15].mxu0  ;;  %v865_v46 = vmul.f32 %v1892_v32, %v1892_v32  ;;  %v1926_v3 = vpop.f32.mrb[15].mxu1 }
  0xfd   :  { %2698 = vst [vmem:[#allocation15_spill] sm:$0xff] %v1896_v34  ;;  %v925_v40 = vadd.f32 %v924_v31, %v862_v30  ;;  %v792_v41 = vadd.f32 %v791_v29, %v1896_v34  ;;  %v863_v42 = vmul.f32 %v1896_v34, %v1896_v34 }
  0xff   :  { %v793_v44 = vadd.f32 %v1880_v24, %v792_v41  ;;  %v926_v45 = vadd.f32 %v925_v40, %v863_v42 }
 0x101   :  { %v927_v47 = vadd.f32 %v926_v45, %v864_v43  ;;  %v1908_v49 = vpop.f32.mrb[16].mxu0  ;;  %v794_v53 = vadd.f32 %v1892_v32, %v793_v44  ;;  %v1939_v22 = vpop.f32.mrb[16].mxu1 }
 0x102   :  { %v1913_v55 = vpop.f32.mrb[17].mxu0  ;;  %v868_v11 = vmul.f32 %v1908_v49, %v1908_v49  ;;  %v1943_v25 = vpop.f32.mrb[17].mxu1 }
 0x103   :  { %v795_v61 = vadd.f32 %v794_v53, %v1913_v55  ;;  %v866_v62 = vmul.f32 %v1913_v55, %v1913_v55  ;;  %v928_v63 = vadd.f32 %v927_v47, %v865_v46  ;;  %v1920_v0 = vpop.f32.mrb[18].mxu0  ;;  %2700 = vst [vmem:[#allocation17_spill] sm:$0xff] %v1943_v25  ;;  %v1950_v41 = vpop.f32.mrb[18].mxu1 }
 0x104   :  { %v1924_v2 = vpop.f32.mrb[19].mxu0  ;;  %v869_v18 = vmul.f32 %v1920_v0, %v1920_v0  ;;  %v1954_v43 = vpop.f32.mrb[19].mxu1 }
 0x105   :  { %v929_v5 = vadd.f32 %v928_v63, %v866_v62  ;;  %v796_v9 = vadd.f32 %v795_v61, %v1924_v2  ;;  %v867_v10 = vmul.f32 %v1924_v2, %v1924_v2 }
 0x107   :  { %v797_v16 = vadd.f32 %v1908_v49, %v796_v9  ;;  %v930_v17 = vadd.f32 %v929_v5, %v867_v10 }
 0x109   :  { %v931_v19 = vadd.f32 %v930_v17, %v868_v11  ;;  %v1936_v20 = vpop.f32.mrb[20].mxu0  ;;  %v798_v21 = vadd.f32 %v1920_v0, %v797_v16  ;;  %v1967_v10 = vpop.f32.mrb[20].mxu1 }
 0x10a   :  { %2699 = vst [vmem:[#allocation16_spill] sm:$0xff] %v1936_v20  ;;  %v1941_v23 = vpop.f32.mrb[21].mxu0  ;;  %v872_v47 = vmul.f32 %v1936_v20, %v1936_v20  ;;  %v1971_v16 = vpop.f32.mrb[21].mxu1 }
 0x10b   :  { %v799_v29 = vadd.f32 %v798_v21, %v1941_v23  ;;  %v870_v30 = vmul.f32 %v1941_v23, %v1941_v23  ;;  %v932_v31 = vadd.f32 %v931_v19, %v869_v18  ;;  %v1948_v40 = vpop.f32.mrb[22].mxu0 }
 0x10c   :  { %2701 = vst [vmem:[#allocation18_spill] sm:$0xff] %v1948_v40  ;;  %v1952_v42 = vpop.f32.mrb[23].mxu0  ;;  %v873_v62 = vmul.f32 %v1948_v40, %v1948_v40 }
 0x10d   :  { %2702 = vst [vmem:[#allocation19_spill] sm:$0xff] %v1952_v42  ;;  %v933_v44 = vadd.f32 %v932_v31, %v870_v30  ;;  %v800_v45 = vadd.f32 %v799_v29, %v1952_v42  ;;  %v871_v46 = vmul.f32 %v1952_v42, %v1952_v42  ;;  %v1978_v29 = vpop.f32.mrb[22].mxu1 }
 0x10e   :  { %v1982_v31 = vpop.f32.mrb[23].mxu1 }
 0x10f   :  { %v801_v53 = vadd.f32 %v1936_v20, %v800_v45  ;;  %v934_v61 = vadd.f32 %v933_v44, %v871_v46 }
 0x111   :  { %v935_v63 = vadd.f32 %v934_v61, %v872_v47  ;;  %v1964_v5 = vpop.f32.mrb[24].mxu0  ;;  %v802_v9 = vadd.f32 %v1948_v40, %v801_v53 }
 0x112   :  { %2703 = vst [vmem:[#allocation20_spill] sm:$0xff] %v1964_v5  ;;  %v1969_v11 = vpop.f32.mrb[25].mxu0  ;;  %v876_v47 = vmul.f32 %v1964_v5, %v1964_v5 }
 0x113   :  { %2704 = vst [vmem:[#allocation21_spill] sm:$0xff] %v1969_v11  ;;  %v803_v17 = vadd.f32 %v802_v9, %v1969_v11  ;;  %v874_v18 = vmul.f32 %v1969_v11, %v1969_v11  ;;  %v936_v19 = vadd.f32 %v935_v63, %v873_v62  ;;  %v1976_v21 = vpop.f32.mrb[26].mxu0 }
 0x114   :  { %2705 = vst [vmem:[#allocation22_spill] sm:$0xff] %v1976_v21  ;;  %v1980_v30 = vpop.f32.mrb[27].mxu0  ;;  %v877_v62 = vmul.f32 %v1976_v21, %v1976_v21 }
 0x115   :  { %2706 = vst [vmem:[#allocation23_spill] sm:$0xff] %v1980_v30  ;;  %v937_v44 = vadd.f32 %v936_v19, %v874_v18  ;;  %v804_v45 = vadd.f32 %v803_v17, %v1980_v30  ;;  %v875_v46 = vmul.f32 %v1980_v30, %v1980_v30  ;;  %v1995_v18 = vpop.f32.mrb[24].mxu1 }
 0x116   :  { %v1999_v19 = vpop.f32.mrb[25].mxu1 }
 0x117   :  { %v805_v53 = vadd.f32 %v1964_v5, %v804_v45  ;;  %v938_v61 = vadd.f32 %v937_v44, %v875_v46  ;;  %v2006_v34 = vpop.f32.mrb[26].mxu1 }
 0x119   :  { %v939_v63 = vadd.f32 %v938_v61, %v876_v47  ;;  %v1992_v9 = vpop.f32.mrb[28].mxu0  ;;  %v806_v32 = vadd.f32 %v1976_v21, %v805_v53  ;;  %v2010_v61 = vpop.f32.mrb[27].mxu1 }
 0x11a   :  { %2707 = vst [vmem:[#allocation24_spill] sm:$0xff] %v1992_v9  ;;  %v1997_v17 = vpop.f32.mrb[29].mxu0 }
 0x11b   :  { %2708 = vst [vmem:[#allocation25_spill] sm:$0xff] %v1997_v17  ;;  %v807_v24 = vadd.f32 %v806_v32, %v1997_v17  ;;  %v878_v45 = vmul.f32 %v1997_v17, %v1997_v17  ;;  %v940_v44 = vadd.f32 %v939_v63, %v877_v62  ;;  %v2004_v46 = vpop.f32.mrb[30].mxu0  ;;  %v880_v32 = vmul.f32 %v1992_v9, %v1992_v9 }
 0x11c   :  { %2709 = vst [vmem:[#allocation26_spill] sm:$0xff] %v2004_v46  ;;  %v2008_v47 = vpop.f32.mrb[31].mxu0  ;;  %v881_v63 = vmul.f32 %v2004_v46, %v2004_v46 }
 0x11d   :  { %v941_v53 = vadd.f32 %v940_v44, %v878_v45  ;;  %v808_v27 = vadd.f32 %v807_v24, %v2008_v47  ;;  %v879_v12 = vmul.f32 %v2008_v47, %v2008_v47  ;;  %v882_v45 = vmul.f32 %v1831_v52, %v1831_v52  ;;  %v2023_v44 = vpop.f32.mrb[28].mxu1 }
 0x11e   :  { %v2025_v24 = vpop.f32.mrb[29].mxu1 }
 0x11f   :  { %v809_v17 = vadd.f32 %v1992_v9, %v808_v27  ;;  %v942_v62 = vadd.f32 %v941_v53, %v879_v12  ;;  %v2028_v30 = vpop.f32.mrb[30].mxu1 }
 0x120   :  { %v2030_v27 = vpop.f32.mrb[31].mxu1 }
 0x121   :  { %v943_v21 = vadd.f32 %v942_v62, %v880_v32  ;;  %v810_v4 = vadd.f32 %v2004_v46, %v809_v17  ;;  %v883_v17 = vmul.f32 %v1842_v59, %v1842_v59  ;;  %v884_v32 = vmul.f32 %v1827_v50, %v1827_v50 }
 0x123   :  { %v811_v5 = vadd.f32 %v810_v4, %v1831_v52  ;;  %v944_v14 = vadd.f32 %v943_v21, %v881_v63  ;;  %v885_v4 = vmul.f32 %v1838_v57, %v1838_v57 }
 0x125   :  { %v945_v12 = vadd.f32 %v944_v14, %v882_v45  ;;  %v812_v53 = vadd.f32 %v811_v5, %v1842_v59  ;;  %v886_v14 = vmul.f32 %v1859_v8, %v1859_v8 }
 0x127   :  { %v813_v62 = vadd.f32 %v1827_v50, %v812_v53  ;;  %v946_v46 = vadd.f32 %v945_v12, %v883_v17  ;;  %v888_v12 = vmul.f32 %v1855_v6, %v1855_v6  ;;  %v889_v17 = vmul.f32 %v1866_v13, %v1866_v13 }
 0x129   :  { %v947_v21 = vadd.f32 %v946_v46, %v884_v32  ;;  %v814_v63 = vadd.f32 %v1838_v57, %v813_v62 }
 0x12b   :  { %v815_v5 = vadd.f32 %v814_v63, %v1859_v8  ;;  %v948_v45 = vadd.f32 %v947_v21, %v885_v4  ;;  %v890_v4 = vmul.f32 %v1887_v28, %v1887_v28 }
 0x12d   :  { %v949_v52 = vadd.f32 %v948_v45, %v886_v14  ;;  %v816_v9 = vadd.f32 %v815_v5, %v1870_v15  ;;  %v891_v45 = vmul.f32 %v1898_v35, %v1898_v35 }
 0x12f   :  { %v817_v53 = vadd.f32 %v1855_v6, %v816_v9  ;;  %v950_v46 = vadd.f32 %v949_v52, %v887_v7  ;;  %v892_v52 = vmul.f32 %v1883_v26, %v1883_v26 }
 0x131   :  { %v951_v32 = vadd.f32 %v950_v46, %v888_v12  ;;  %v818_v62 = vadd.f32 %v1866_v13, %v817_v53  ;;  %v893_v12 = vmul.f32 %v1894_v33, %v1894_v33 }
 0x133   :  { %v819_v21 = vadd.f32 %v818_v62, %v1887_v28  ;;  %v952_v63 = vadd.f32 %v951_v32, %v889_v17  ;;  %v894_v17 = vmul.f32 %v1915_v60, %v1915_v60 }
 0x135   :  { %v953_v14 = vadd.f32 %v952_v63, %v890_v4  ;;  %v820_v5 = vadd.f32 %v819_v21, %v1898_v35  ;;  %v895_v63 = vmul.f32 %v1926_v3, %v1926_v3 }
 0x137   :  { %v821_v7 = vadd.f32 %v1883_v26, %v820_v5  ;;  %v954_v9 = vadd.f32 %v953_v14, %v891_v45  ;;  %v896_v14 = vmul.f32 %v1911_v54, %v1911_v54 }
 0x139   :  { %v955_v53 = vadd.f32 %v954_v9, %v892_v52  ;;  %v822_v46 = vadd.f32 %v1894_v33, %v821_v7  ;;  %v897_v52 = vmul.f32 %v1922_v1, %v1922_v1 }
 0x13b   :  { %v823_v32 = vadd.f32 %v822_v46, %v1915_v60  ;;  %v956_v62 = vadd.f32 %v955_v53, %v893_v12  ;;  %v898_v12 = vmul.f32 %v1943_v25, %v1943_v25 }
 0x13d   :  { %v957_v4 = vadd.f32 %v956_v62, %v894_v17  ;;  %v824_v21 = vadd.f32 %v823_v32, %v1926_v3  ;;  %v899_v62 = vmul.f32 %v1954_v43, %v1954_v43 }
 0x13f   :  { %v825_v5 = vadd.f32 %v1911_v54, %v824_v21  ;;  %v958_v45 = vadd.f32 %v957_v4, %v895_v63  ;;  %v900_v4 = vmul.f32 %v1939_v22, %v1939_v22 }
 0x141   :  { %v959_v7 = vadd.f32 %v958_v45, %v896_v14  ;;  %v826_v9 = vadd.f32 %v1922_v1, %v825_v5  ;;  %v901_v14 = vmul.f32 %v1950_v41, %v1950_v41 }
 0x143   :  { %v827_v53 = vadd.f32 %v826_v9, %v1943_v25  ;;  %v960_v46 = vadd.f32 %v959_v7, %v897_v52  ;;  %v902_v52 = vmul.f32 %v1971_v16, %v1971_v16 }
 0x145   :  { %v961_v17 = vadd.f32 %v960_v46, %v898_v12  ;;  %v828_v32 = vadd.f32 %v827_v53, %v1954_v43  ;;  %v903_v46 = vmul.f32 %v1982_v31, %v1982_v31 }
 0x147   :  { %v829_v21 = vadd.f32 %v1939_v22, %v828_v32  ;;  %v962_v63 = vadd.f32 %v961_v17, %v899_v62  ;;  %v904_v17 = vmul.f32 %v1967_v10, %v1967_v10 }
 0x149   :  { %v963_v5 = vadd.f32 %v962_v63, %v900_v4  ;;  %v830_v45 = vadd.f32 %v1950_v41, %v829_v21  ;;  %v905_v4 = vmul.f32 %v1978_v29, %v1978_v29 }
 0x14b   :  { %v831_v7 = vadd.f32 %v830_v45, %v1971_v16  ;;  %v964_v9 = vadd.f32 %v963_v5, %v901_v14  ;;  %v906_v14 = vmul.f32 %v1999_v19, %v1999_v19 }
 0x14d   :  { %v965_v12 = vadd.f32 %v964_v9, %v902_v52  ;;  %v832_v53 = vadd.f32 %v831_v7, %v1982_v31  ;;  %v907_v9 = vmul.f32 %v2010_v61, %v2010_v61 }
 0x14f   :  { %v833_v32 = vadd.f32 %v1967_v10, %v832_v53  ;;  %v966_v62 = vadd.f32 %v965_v12, %v903_v46  ;;  %v908_v12 = vmul.f32 %v1995_v18, %v1995_v18 }
 0x151   :  { %v967_v21 = vadd.f32 %v966_v62, %v904_v17  ;;  %v834_v63 = vadd.f32 %v1978_v29, %v833_v32  ;;  %v909_v17 = vmul.f32 %v2006_v34, %v2006_v34 }
 0x153   :  { %v835_v5 = vadd.f32 %v834_v63, %v1999_v19  ;;  %v968_v45 = vadd.f32 %v967_v21, %v905_v4  ;;  %v910_v4 = vmul.f32 %v2025_v24, %v2025_v24 }
 0x155   :  { %v969_v52 = vadd.f32 %v968_v45, %v906_v14  ;;  %v836_v7 = vadd.f32 %v835_v5, %v2010_v61  ;;  %v911_v45 = vmul.f32 %v2030_v27, %v2030_v27 }
 0x157   :  { %v837_v53 = vadd.f32 %v1995_v18, %v836_v7  ;;  %v970_v46 = vadd.f32 %v969_v52, %v907_v9  ;;  %v912_v52 = vmul.f32 %v2023_v44, %v2023_v44 }
 0x159   :  { %v971_v32 = vadd.f32 %v970_v46, %v908_v12  ;;  %v838_v62 = vadd.f32 %v2006_v34, %v837_v53  ;;  %v913_v12 = vmul.f32 %v2028_v30, %v2028_v30 }
 0x15b   :  { %v839_v21 = vadd.f32 %v838_v62, %v2025_v24  ;;  %v972_v63 = vadd.f32 %v971_v32, %v909_v17 }
 0x15d   :  { %v973_v14 = vadd.f32 %v972_v63, %v910_v4  ;;  %v840_v5 = vadd.f32 %v839_v21, %v2030_v27 }
 0x15f   :  { %v841_v7 = vadd.f32 %v2023_v44, %v840_v5  ;;  %v974_v9 = vadd.f32 %v973_v14, %v911_v45 }
 0x161   :  { %v842_v53 = vadd.f32 %v2028_v30, %v841_v7  ;;  %v975_v46 = vadd.f32 %v974_v9, %v912_v52  ;;  %v1026_v52 = vlaneseq  ;;  %v986_v9 = vld [vmem:[%s2659_s2] sm:$0x1] }
 0x163   :  { %v843_v62 = vrot.slane %v842_v53, 4  ;;  %v976_v17 = vadd.f32 %v975_v46, %v913_v12  ;;  %v1027_v7 = vshrl.u32 %v1026_v52, 7 }
 0x165   :  { %v844_v32 = vadd.f32 %v843_v62, %v842_v53  ;;  %v977_v4 = vrot.slane %v976_v17, 4  ;;  %v1028_v12 = vsub.s32 0, %v1027_v7  ;;  %v2713_v7 = vld [vmem:[#allocation7_spill] sm:$0xff] }
 0x167   :  { %v845_v21 = vrot.slane %v844_v32, 2  ;;  %v978_v63 = vadd.f32 %v977_v4, %v976_v17 }
 0x169   :  { %v846_v25 = vadd.f32 %v845_v21, %v844_v32  ;;  %v979_v11 = vrot.slane %v978_v63, 2 }
 0x16b   :  { %v847_v56 = vrot.slane %v846_v25, 1  ;;  %v980_v40 = vadd.f32 %v979_v11, %v978_v63 }
 0x16d   :  { %v848_v48 = vadd.f32 %v847_v56, %v846_v25  ;;  %v981_v20 = vrot.slane %v980_v40, 1  ;;  %v990_v56 = vld [vmem:[%s2660_s3] sm:$0x1] }
 0x16f   :  { %v849_v5 = vmul.f32 0.001953125, %v848_v48  ;;  %v982_v14 = vadd.f32 %v981_v20, %v980_v40 }
 0x171   :  { %v983_v45 = vmul.f32 0.001953125, %v982_v14  ;;  %v984_v58 = vmul.f32 %v849_v5, %v849_v5  ;;  %v2711_v14 = vld [vmem:[#allocation4_spill] sm:$0xff] }
 0x173   :  { %v985_v42 = vsub.f32 %v983_v45, %v984_v58  ;;  %v2712_v45 = vld [vmem:[#allocation19_spill] sm:$0xff] }
 0x175   :  { %v987_v51 = vadd.f32 1e-05, %v985_v42 }
 0x177   :  { %1641 = vrsqrt.f32 %v987_v51 }
 0x181   :  { %v1642_v53 = vpop.eup %1641 }
 0x182   :  { %v989_v46 = vmul.f32 %v1642_v53, %v986_v9 }
 0x184   :  { %v991_v48 = vmul.f32 %v989_v46, %v849_v5  ;;  %v2131_v20 = vrot.slane %v989_v46, %v1028_v12 }
 0x186   :  { %v992_v25 = vsub.f32 %v990_v56, %v991_v48  ;;  %v1258_v51 = vmul.f32 %v2131_v20, %v2030_v27  ;;  %v2137_v58 = vmul.f32 %v2131_v20, %v2008_v47  ;;  %v2141_v40 = vmul.f32 %v2131_v20, %v1842_v59  ;;  %v2715_v56 = vld [vmem:[#allocation3_spill] sm:$0xff] }
 0x187   :  { %v2145_v42 = vmul.f32 %v1827_v50, %v2131_v20  ;;  %v2149_v11 = vmul.f32 %v1838_v57, %v2131_v20  ;;  %v2153_v62 = vmul.f32 %v2131_v20, %v1859_v8  ;;  %v2157_v47 = vmul.f32 %v2131_v20, %v1870_v15 }
 0x188   :  { %v2159_v27 = vrot.slane %v992_v25, %v1028_v12  ;;  %v2163_v59 = vmul.f32 %v1855_v6, %v2131_v20  ;;  %v2167_v50 = vmul.f32 %v1866_v13, %v2131_v20  ;;  %v2171_v57 = vmul.f32 %v2131_v20, %v1887_v28  ;;  %v2714_v12 = vld [vmem:[#allocation16_spill] sm:$0xff]  ;;  %v2716_v25 = vld [vmem:[#allocation18_spill] sm:$0xff] }
 0x189   :  { %v2175_v8 = vmul.f32 %v2131_v20, %v1898_v35  ;;  %v2179_v15 = vmul.f32 %v1883_v26, %v2131_v20  ;;  %v2183_v6 = vmul.f32 %v1894_v33, %v2131_v20  ;;  %v2187_v13 = vmul.f32 %v2131_v20, %v1915_v60 }
 0x18a   :  { %v2190_v17 = vadd.f32 %v1258_v51, %v2159_v27  ;;  %v2194_v28 = vmul.f32 %v2131_v20, %v1926_v3  ;;  %v2198_v35 = vmul.f32 %v1911_v54, %v2131_v20  ;;  %v2202_v26 = vmul.f32 %v1922_v1, %v2131_v20  ;;  %v2717_v51 = vld [vmem:[#allocation6_spill] sm:$0xff] }
 0x18b   :  { %v2206_v33 = vmul.f32 %v2131_v20, %v1954_v43  ;;  %v2210_v60 = vmul.f32 %v1939_v22, %v2131_v20  ;;  %v2214_v3 = vmul.f32 %v1950_v41, %v2131_v20  ;;  %v2218_v54 = vmul.f32 %v2131_v20, %v1971_v16 }
 0x18c   :  { %2710 = vst [vmem:[#allocation27_spill] sm:$0xff] %v2190_v17  ;;  %v2222_v1 = vmul.f32 %v2131_v20, %v1982_v31  ;;  %v2226_v43 = vmul.f32 %v1967_v10, %v2131_v20  ;;  %v2230_v22 = vmul.f32 %v1978_v29, %v2131_v20  ;;  %v2234_v41 = vmul.f32 %v2131_v20, %v1999_v19  ;;  %v2735_v17 = vld [vmem:[#allocation14_spill] sm:$0xff] }
 0x18d   :  { %v2238_v16 = vmul.f32 %v2131_v20, %v2010_v61  ;;  %v2242_v31 = vmul.f32 %v1995_v18, %v2131_v20  ;;  %v2246_v10 = vmul.f32 %v2006_v34, %v2131_v20  ;;  %v2250_v29 = vmul.f32 %v2131_v20, %v2025_v24 }
 0x18e   :  { %v2254_v19 = vmul.f32 %v2023_v44, %v2131_v20  ;;  %v2258_v61 = vmul.f32 %v2028_v30, %v2131_v20  ;;  %v1047_v18 = vmul.f32 %v2131_v20, %v1913_v55  ;;  %v1031_v32 = vmul.f32 %v2131_v20, %v1807_v37 }
 0x18f   :  { %v1048_v34 = vmul.f32 %v2131_v20, %v1924_v2  ;;  %v1032_v24 = vmul.f32 %v2131_v20, %v1811_v39  ;;  %v1049_v44 = vmul.f32 %v1908_v49, %v2131_v20  ;;  %v1033_v4 = vmul.f32 %v1805_v36, %v2131_v20 }
 0x190   :  { %v1085_v30 = vadd.f32 %v2159_v27, %v1047_v18  ;;  %v1069_v21 = vadd.f32 %v2159_v27, %v1031_v32  ;;  %v1050_v55 = vmul.f32 %v1920_v0, %v2131_v20  ;;  %v1034_v37 = vmul.f32 %v1809_v38, %v2131_v20 }
 0x191   :  { %v1086_v2 = vadd.f32 %v2159_v27, %v1048_v34  ;;  %v1070_v39 = vadd.f32 %v2159_v27, %v1032_v24  ;;  %v1087_v63 = vadd.f32 %v2159_v27, %v1049_v44  ;;  %v1071_v49 = vadd.f32 %v2159_v27, %v1033_v4 }
 0x192   :  { %1133 = vxpose.xlu1.b32.start [1/16] %v1085_v30, 128  ;;  %1101 = vxpose.xlu0.b32.start [1/16] %v1069_v21, 128  ;;  %v1088_v36 = vadd.f32 %v2159_v27, %v1050_v55  ;;  %v1072_v5 = vadd.f32 %v2159_v27, %v1034_v37  ;;  %v1051_v0 = vmul.f32 %v2131_v20, %v1941_v23  ;;  %v2718_v55 = vld [vmem:[#allocation21_spill] sm:$0xff] }
 0x193   :  { %v1035_v38 = vmul.f32 %v2131_v20, %v2711_v14  ;;  %v1052_v52 = vmul.f32 %v2131_v20, %v2712_v45  ;;  %v1036_v9 = vmul.f32 %v2131_v20, %v2713_v7  ;;  %v1053_v53 = vmul.f32 %v2714_v12, %v2131_v20 }
 0x194   :  { %v1089_v46 = vadd.f32 %v2159_v27, %v1051_v0  ;;  %v1037_v48 = vmul.f32 %v2715_v56, %v2131_v20  ;;  %v1054_v23 = vmul.f32 %v2716_v25, %v2131_v20  ;;  %v1038_v18 = vmul.f32 %v2717_v51, %v2131_v20  ;;  %v2719_v0 = vld [vmem:[#allocation9_spill] sm:$0xff] }
 0x195   :  { %v1073_v32 = vadd.f32 %v2159_v27, %v1035_v38  ;;  %v2303_v34 = vadd.f32 %v2159_v27, %v1052_v52  ;;  %v2306_v24 = vadd.f32 %v2159_v27, %v1036_v9  ;;  %v2309_v44 = vadd.f32 %v2159_v27, %v1053_v53  ;;  %v2720_v38 = vld [vmem:[#allocation23_spill] sm:$0xff]  ;;  %v2722_v52 = vld [vmem:[#allocation20_spill] sm:$0xff]  ;;  %v2724_v53 = vld [vmem:[#allocation22_spill] sm:$0xff] }
 0x196   :  { %1134 = vxpose.xlu1.b32.cont [2/16] %v1086_v2, 128  ;;  %1102 = vxpose.xlu0.b32.cont [2/16] %v1070_v39, 128  ;;  %v2312_v4 = vadd.f32 %v2159_v27, %v1037_v48  ;;  %v2315_v30 = vadd.f32 %v2159_v27, %v1054_v23  ;;  %v2318_v21 = vadd.f32 %v2159_v27, %v1038_v18  ;;  %v2721_v2 = vld [vmem:[#allocation11_spill] sm:$0xff]  ;;  %v2723_v9 = vld [vmem:[#allocation8_spill] sm:$0xff]  ;;  %v2725_v48 = vld [vmem:[#allocation10_spill] sm:$0xff] }
 0x197   :  { %v1055_v37 = vmul.f32 %v2131_v20, %v2718_v55  ;;  %v1039_v14 = vmul.f32 %v2131_v20, %v2719_v0  ;;  %v1056_v45 = vmul.f32 %v2131_v20, %v2720_v38  ;;  %v1040_v39 = vmul.f32 %v2131_v20, %v2721_v2  ;;  %v2728_v2 = vld [vmem:[#allocation25_spill] sm:$0xff] }
 0x198   :  { %v1057_v7 = vmul.f32 %v2722_v52, %v2131_v20  ;;  %v1041_v12 = vmul.f32 %v2723_v9, %v2131_v20  ;;  %v1058_v56 = vmul.f32 %v2724_v53, %v2131_v20  ;;  %v1042_v25 = vmul.f32 %v2725_v48, %v2131_v20  ;;  %v2729_v52 = vld [vmem:[#allocation13_spill] sm:$0xff]  ;;  %v2732_v9 = vld [vmem:[#allocation24_spill] sm:$0xff]  ;;  %v2734_v48 = vld [vmem:[#allocation26_spill] sm:$0xff] }
 0x199   :  { %v2337_v23 = vadd.f32 %v2159_v27, %v1055_v37  ;;  %v2340_v51 = vadd.f32 %v2159_v27, %v1039_v14  ;;  %v2343_v18 = vadd.f32 %v2159_v27, %v1056_v45  ;;  %v2346_v55 = vadd.f32 %v2159_v27, %v1040_v39  ;;  %v2733_v53 = vld [vmem:[#allocation12_spill] sm:$0xff] }
 0x19a   :  { %1135 = vxpose.xlu1.b32.cont [3/16] %v1087_v63, 128  ;;  %1103 = vxpose.xlu0.b32.cont [3/16] %v1071_v49, 128  ;;  %v2349_v0 = vadd.f32 %v2159_v27, %v1057_v7  ;;  %v2352_v38 = vadd.f32 %v2159_v27, %v1041_v12  ;;  %v2355_v37 = vadd.f32 %v2159_v27, %v1058_v56  ;;  %v2731_v49 = vld [vmem:[#allocation15_spill] sm:$0xff] }
 0x19b   :  { %v2358_v14 = vadd.f32 %v2159_v27, %v1042_v25  ;;  %v1059_v45 = vmul.f32 %v2131_v20, %v2728_v2  ;;  %v1043_v39 = vmul.f32 %v2131_v20, %v2729_v52  ;;  %v2366_v63 = vadd.f32 %v2159_v27, %v2137_v58 }
 0x19c   :  { %2726 = vst [vmem:[#allocation4_spill] sm:$0xff] %v2355_v37  ;;  %v1044_v7 = vmul.f32 %v2131_v20, %v2731_v49  ;;  %v1061_v12 = vmul.f32 %v2732_v9, %v2131_v20  ;;  %v1045_v56 = vmul.f32 %v2733_v53, %v2131_v20  ;;  %v1062_v25 = vmul.f32 %v2734_v48, %v2131_v20  ;;  %v2737_v37 = vld [vmem:[#allocation5_spill] sm:$0xff] }
 0x19d   :  { %2727 = vst [vmem:[#allocation19_spill] sm:$0xff] %v2358_v14  ;;  %2730 = vst [vmem:[#allocation7_spill] sm:$0xff] %v2366_v63  ;;  %v1097_v2 = vadd.f32 %v2159_v27, %v1059_v45  ;;  %v1081_v52 = vadd.f32 %v2159_v27, %v1043_v39  ;;  %v1046_v58 = vmul.f32 %v2735_v17, %v2131_v20  ;;  %v2736_v63 = vld [vmem:[#allocation17_spill] sm:$0xff] }
 0x19e   :  { %v1245_v14 = vmul.f32 %v2131_v20, %v2736_v63  ;;  %1136 = vxpose.xlu1.b32.cont [4/16] %v1088_v36, 128  ;;  %1104 = vxpose.xlu0.b32.cont [4/16] %v1072_v5, 128  ;;  %v1082_v49 = vadd.f32 %v2159_v27, %v1044_v7  ;;  %v1099_v9 = vadd.f32 %v2159_v27, %v1061_v12 }
 0x19f   :  { %v1083_v53 = vadd.f32 %v2159_v27, %v1045_v56  ;;  %v1100_v48 = vadd.f32 %v2159_v27, %v1062_v25  ;;  %v1084_v45 = vadd.f32 %v2159_v27, %v1046_v58  ;;  %v1229_v17 = vmul.f32 %v2131_v20, %v2737_v37 }
 0x1a0   :  { %v1277_v39 = vadd.f32 %v1245_v14, %v2159_v27  ;;  %v1278_v63 = vadd.f32 %v2206_v33, %v2159_v27  ;;  %v1262_v36 = vadd.f32 %v2141_v40, %v2159_v27  ;;  %v1279_v5 = vadd.f32 %v2210_v60, %v2159_v27 }
 0x1a1   :  { %v1263_v7 = vadd.f32 %v2145_v42, %v2159_v27  ;;  %v1261_v12 = vadd.f32 %v1229_v17, %v2159_v27  ;;  %v1280_v14 = vadd.f32 %v2214_v3, %v2159_v27  ;;  %v1264_v20 = vadd.f32 %v2149_v11, %v2159_v27 }
 0x1a2   :  { %v1281_v33 = vadd.f32 %v2218_v54, %v2159_v27  ;;  %1137 = vxpose.xlu1.b32.cont [5/16] %v1089_v46, 128  ;;  %1105 = vxpose.xlu0.b32.cont [5/16] %v1073_v32, 128  ;;  %v1265_v40 = vadd.f32 %v2153_v62, %v2159_v27  ;;  %v1282_v60 = vadd.f32 %v2222_v1, %v2159_v27 }
 0x1a3   :  { %v1266_v42 = vadd.f32 %v2157_v47, %v2159_v27  ;;  %v1283_v3 = vadd.f32 %v2226_v43, %v2159_v27  ;;  %v1267_v11 = vadd.f32 %v2163_v59, %v2159_v27  ;;  %v1284_v54 = vadd.f32 %v2230_v22, %v2159_v27 }
 0x1a4   :  { %v1268_v46 = vadd.f32 %v2167_v50, %v2159_v27  ;;  %v1285_v62 = vadd.f32 %v2234_v41, %v2159_v27  ;;  %v1269_v1 = vadd.f32 %v2171_v57, %v2159_v27  ;;  %v1286_v47 = vadd.f32 %v2238_v16, %v2159_v27 }
 0x1a5   :  { %v1270_v43 = vadd.f32 %v2175_v8, %v2159_v27  ;;  %v1287_v59 = vadd.f32 %v2242_v31, %v2159_v27  ;;  %v1271_v22 = vadd.f32 %v2179_v15, %v2159_v27  ;;  %v1288_v50 = vadd.f32 %v2246_v10, %v2159_v27 }
 0x1a6   :  { %v1272_v41 = vadd.f32 %v2183_v6, %v2159_v27  ;;  %1138 = vxpose.xlu1.b32.cont [6/16] %v2303_v34, 128  ;;  %1106 = vxpose.xlu0.b32.cont [6/16] %v2306_v24, 128  ;;  %v1289_v57 = vadd.f32 %v2250_v29, %v2159_v27  ;;  %v1273_v8 = vadd.f32 %v2187_v13, %v2159_v27  ;;  %v2739_v13 = vld [vmem:[#allocation19_spill] sm:$0xff] }
 0x1a7   :  { %v1274_v16 = vadd.f32 %v2194_v28, %v2159_v27  ;;  %v1291_v15 = vadd.f32 %v2254_v19, %v2159_v27  ;;  %v1275_v31 = vadd.f32 %v2198_v35, %v2159_v27  ;;  %v1292_v6 = vadd.f32 %v2258_v61, %v2159_v27  ;;  %v2740_v28 = vld [vmem:[#allocation7_spill] sm:$0xff] }
 0x1a8   :  { %v1276_v10 = vadd.f32 %v2202_v26, %v2159_v27  ;;  %v2738_v27 = vld [vmem:[#allocation4_spill] sm:$0xff]  ;;  %v2741_v35 = vld [vmem:[#allocation27_spill] sm:$0xff] }
 0x1aa   :  { %1139 = vxpose.xlu1.b32.cont [7/16] %v2309_v44, 128  ;;  %1107 = vxpose.xlu0.b32.cont [7/16] %v2312_v4, 128 }
 0x1ae   :  { %1140 = vxpose.xlu1.b32.cont [8/16] %v2315_v30, 128  ;;  %1108 = vxpose.xlu0.b32.cont [8/16] %v2318_v21, 128 }
 0x1b2   :  { %1141 = vxpose.xlu1.b32.cont [9/16] %v2337_v23, 128  ;;  %1109 = vxpose.xlu0.b32.cont [9/16] %v2340_v51, 128 }
 0x1b6   :  { %1142 = vxpose.xlu1.b32.cont [10/16] %v2343_v18, 128  ;;  %1110 = vxpose.xlu0.b32.cont [10/16] %v2346_v55, 128 }
 0x1ba   :  { %1143 = vxpose.xlu1.b32.cont [11/16] %v2349_v0, 128  ;;  %1111 = vxpose.xlu0.b32.cont [11/16] %v2352_v38, 128 }
 0x1be   :  { %1144 = vxpose.xlu1.b32.cont [12/16] %v2738_v27, 128  ;;  %1112 = vxpose.xlu0.b32.cont [12/16] %v2739_v13, 128 }
 0x1c2   :  { %1145 = vxpose.xlu1.b32.cont [13/16] %v1097_v2, 128  ;;  %1113 = vxpose.xlu0.b32.cont [13/16] %v1081_v52, 128 }
 0x1c6   :  { %1146 = vxpose.xlu1.b32.cont [14/16] %v2740_v28, 128  ;;  %1114 = vxpose.xlu0.b32.cont [14/16] %v1082_v49, 128 }
 0x1ca   :  { %1147 = vxpose.xlu1.b32.cont [15/16] %v1099_v9, 128  ;;  %1115 = vxpose.xlu0.b32.cont [15/16] %v1083_v53, 128 }
 0x1ce   :  { %1148 = vxpose.xlu1.b32.end [16/16] %v1100_v48, 128  ;;  %1116 = vxpose.xlu0.b32.end [16/16] %v1084_v45, 128 }
 0x1d2   :  { %1325 = vxpose.xlu1.b32.start [1/16] %v1277_v39, 128  ;;  %1293 = vxpose.xlu0.b32.start [1/16] %v1261_v12, 128 }
 0x1d6   :  { %1326 = vxpose.xlu1.b32.cont [2/16] %v1278_v63, 128  ;;  %1294 = vxpose.xlu0.b32.cont [2/16] %v1262_v36, 128 }
 0x1da   :  { %1327 = vxpose.xlu1.b32.cont [3/16] %v1279_v5, 128  ;;  %1295 = vxpose.xlu0.b32.cont [3/16] %v1263_v7, 128 }
 0x1de   :  { %1328 = vxpose.xlu1.b32.cont [4/16] %v1280_v14, 128  ;;  %1296 = vxpose.xlu0.b32.cont [4/16] %v1264_v20, 128 }
 0x1e2   :  { %1329 = vxpose.xlu1.b32.cont [5/16] %v1281_v33, 128  ;;  %1297 = vxpose.xlu0.b32.cont [5/16] %v1265_v40, 128 }
 0x1e6   :  { %1330 = vxpose.xlu1.b32.cont [6/16] %v1282_v60, 128  ;;  %1298 = vxpose.xlu0.b32.cont [6/16] %v1266_v42, 128 }
 0x1ea   :  { %1331 = vxpose.xlu1.b32.cont [7/16] %v1283_v3, 128  ;;  %1299 = vxpose.xlu0.b32.cont [7/16] %v1267_v11, 128 }
 0x1ee   :  { %1332 = vxpose.xlu1.b32.cont [8/16] %v1284_v54, 128  ;;  %1300 = vxpose.xlu0.b32.cont [8/16] %v1268_v46, 128 }
 0x1f2   :  { %1333 = vxpose.xlu1.b32.cont [9/16] %v1285_v62, 128  ;;  %1301 = vxpose.xlu0.b32.cont [9/16] %v1269_v1, 128 }
 0x1f6   :  { %1334 = vxpose.xlu1.b32.cont [10/16] %v1286_v47, 128  ;;  %1302 = vxpose.xlu0.b32.cont [10/16] %v1270_v43, 128 }
 0x1fa   :  { %1335 = vxpose.xlu1.b32.cont [11/16] %v1287_v59, 128  ;;  %1303 = vxpose.xlu0.b32.cont [11/16] %v1271_v22, 128 }
 0x1fe   :  { %1336 = vxpose.xlu1.b32.cont [12/16] %v1288_v50, 128  ;;  %1304 = vxpose.xlu0.b32.cont [12/16] %v1272_v41, 128 }
 0x202   :  { %1337 = vxpose.xlu1.b32.cont [13/16] %v1289_v57, 128  ;;  %1305 = vxpose.xlu0.b32.cont [13/16] %v1273_v8, 128 }
 0x206   :  { %1338 = vxpose.xlu1.b32.cont [14/16] %v2741_v35, 128  ;;  %1306 = vxpose.xlu0.b32.cont [14/16] %v1274_v16, 128 }
 0x20a   :  { %1339 = vxpose.xlu1.b32.cont [15/16] %v1291_v15, 128  ;;  %1307 = vxpose.xlu0.b32.cont [15/16] %v1275_v31, 128 }
 0x20e   :  { %1340 = vxpose.xlu1.b32.end [16/16] %v1292_v6, 128  ;;  %1308 = vxpose.xlu0.b32.end [16/16] %v1276_v10, 128 }
 0x212   :  { %v1149_v26 = vpop.trf.xlu1  ;;  %v1117_v29 = vpop.trf.xlu0 }
 0x213   :  { %1166 = vst [vmem:[%s2661_s4 + $0x8] sm:$0xff] %v1149_v26  ;;  %1165 = vst [vmem:[%s2661_s4] sm:$0xff] %v1117_v29 }
 0x216   :  { %v1150_v19 = vpop.trf.xlu1  ;;  %v1118_v61 = vpop.trf.xlu0 }
 0x217   :  { %1168 = vst [vmem:[%s2661_s4 + $0x18] sm:$0xff] %v1150_v19  ;;  %1167 = vst [vmem:[%s2661_s4 + $0x10] sm:$0xff] %v1118_v61 }
 0x21a   :  { %v1151_v32 = vpop.trf.xlu1  ;;  %v1119_v34 = vpop.trf.xlu0 }
 0x21b   :  { %1170 = vst [vmem:[%s2661_s4 + $0x28] sm:$0xff] %v1151_v32  ;;  %1169 = vst [vmem:[%s2661_s4 + $0x20] sm:$0xff] %v1119_v34 }
 0x21e   :  { %v1152_v24 = vpop.trf.xlu1  ;;  %v1120_v44 = vpop.trf.xlu0 }
 0x21f   :  { %1172 = vst [vmem:[%s2661_s4 + $0x38] sm:$0xff] %v1152_v24  ;;  %1171 = vst [vmem:[%s2661_s4 + $0x30] sm:$0xff] %v1120_v44 }
 0x222   :  { %v1153_v4 = vpop.trf.xlu1  ;;  %v1121_v30 = vpop.trf.xlu0 }
 0x223   :  { %1174 = vst [vmem:[%s2661_s4 + $0x48] sm:$0xff] %v1153_v4  ;;  %1173 = vst [vmem:[%s2661_s4 + $0x40] sm:$0xff] %v1121_v30 }
 0x226   :  { %v1154_v21 = vpop.trf.xlu1  ;;  %v1122_v23 = vpop.trf.xlu0 }
 0x227   :  { %1176 = vst [vmem:[%s2661_s4 + $0x58] sm:$0xff] %v1154_v21  ;;  %1175 = vst [vmem:[%s2661_s4 + $0x50] sm:$0xff] %v1122_v23 }
 0x22a   :  { %v1155_v51 = vpop.trf.xlu1  ;;  %v1123_v18 = vpop.trf.xlu0 }
 0x22b   :  { %1178 = vst [vmem:[%s2661_s4 + $0x68] sm:$0xff] %v1155_v51  ;;  %1177 = vst [vmem:[%s2661_s4 + $0x60] sm:$0xff] %v1123_v18 }
 0x22e   :  { %v1156_v55 = vpop.trf.xlu1  ;;  %v1124_v0 = vpop.trf.xlu0 }
 0x22f   :  { %1180 = vst [vmem:[%s2661_s4 + $0x78] sm:$0xff] %v1156_v55  ;;  %1179 = vst [vmem:[%s2661_s4 + $0x70] sm:$0xff] %v1124_v0 }
 0x232   :  { %v1157_v38 = vpop.trf.xlu1  ;;  %v1125_v37 = vpop.trf.xlu0 }
 0x233   :  { %1182 = vst [vmem:[%s2661_s4 + $0x88] sm:$0xff] %v1157_v38  ;;  %1181 = vst [vmem:[%s2661_s4 + $0x80] sm:$0xff] %v1125_v37 }
 0x236   :  { %v1158_v56 = vpop.trf.xlu1  ;;  %v1126_v25 = vpop.trf.xlu0 }
 0x237   :  { %1184 = vst [vmem:[%s2661_s4 + $0x98] sm:$0xff] %v1158_v56  ;;  %1183 = vst [vmem:[%s2661_s4 + $0x90] sm:$0xff] %v1126_v25 }
 0x23a   :  { %v1159_v2 = vpop.trf.xlu1  ;;  %v1127_v52 = vpop.trf.xlu0 }
 0x23b   :  { %1186 = vst [vmem:[%s2661_s4 + $0xa8] sm:$0xff] %v1159_v2  ;;  %1185 = vst [vmem:[%s2661_s4 + $0xa0] sm:$0xff] %v1127_v52 }
 0x23e   :  { %v1160_v58 = vpop.trf.xlu1  ;;  %v1128_v49 = vpop.trf.xlu0 }
 0x23f   :  { %1188 = vst [vmem:[%s2661_s4 + $0xb8] sm:$0xff] %v1160_v58  ;;  %1187 = vst [vmem:[%s2661_s4 + $0xb0] sm:$0xff] %v1128_v49 }
 0x242   :  { %v1161_v9 = vpop.trf.xlu1  ;;  %v1129_v53 = vpop.trf.xlu0 }
 0x243   :  { %1190 = vst [vmem:[%s2661_s4 + $0xc8] sm:$0xff] %v1161_v9  ;;  %1189 = vst [vmem:[%s2661_s4 + $0xc0] sm:$0xff] %v1129_v53 }
 0x246   :  { %v1162_v48 = vpop.trf.xlu1  ;;  %v1130_v45 = vpop.trf.xlu0 }
 0x247   :  { %1192 = vst [vmem:[%s2661_s4 + $0xd8] sm:$0xff] %v1162_v48  ;;  %1191 = vst [vmem:[%s2661_s4 + $0xd0] sm:$0xff] %v1130_v45 }
 0x24a   :  { %v1163_v39 = vpop.trf.xlu1  ;;  %v1131_v17 = vpop.trf.xlu0 }
 0x24b   :  { %1194 = vst [vmem:[%s2661_s4 + $0xe8] sm:$0xff] %v1163_v39  ;;  %1193 = vst [vmem:[%s2661_s4 + $0xe0] sm:$0xff] %v1131_v17 }
 0x24e   :  { %v1164_v63 = vpop.trf.xlu1  ;;  %v1132_v36 = vpop.trf.xlu0 }
 0x24f   :  { %1196 = vst [vmem:[%s2661_s4 + $0xf8] sm:$0xff] %v1164_v63  ;;  %1195 = vst [vmem:[%s2661_s4 + $0xf0] sm:$0xff] %v1132_v36 }
 0x252   :  { %v1341_v5 = vpop.trf.xlu1  ;;  %v1309_v7 = vpop.trf.xlu0 }
 0x253   :  { %1462 = vst [vmem:[%s2661_s4 + $0x108] sm:$0xff] %v1341_v5  ;;  %1461 = vst [vmem:[%s2661_s4 + $0x100] sm:$0xff] %v1309_v7 }
 0x256   :  { %v1342_v12 = vpop.trf.xlu1  ;;  %v1310_v14 = vpop.trf.xlu0 }
 0x257   :  { %1464 = vst [vmem:[%s2661_s4 + $0x118] sm:$0xff] %v1342_v12  ;;  %1463 = vst [vmem:[%s2661_s4 + $0x110] sm:$0xff] %v1310_v14 }
 0x25a   :  { %v1343_v20 = vpop.trf.xlu1  ;;  %v1311_v33 = vpop.trf.xlu0 }
 0x25b   :  { %1466 = vst [vmem:[%s2661_s4 + $0x128] sm:$0xff] %v1343_v20  ;;  %1465 = vst [vmem:[%s2661_s4 + $0x120] sm:$0xff] %v1311_v33 }
 0x25e   :  { %v1344_v40 = vpop.trf.xlu1  ;;  %v1312_v60 = vpop.trf.xlu0 }
 0x25f   :  { %1468 = vst [vmem:[%s2661_s4 + $0x138] sm:$0xff] %v1344_v40  ;;  %1467 = vst [vmem:[%s2661_s4 + $0x130] sm:$0xff] %v1312_v60 }
 0x262   :  { %v1345_v42 = vpop.trf.xlu1  ;;  %v1313_v3 = vpop.trf.xlu0 }
 0x263   :  { %1470 = vst [vmem:[%s2661_s4 + $0x148] sm:$0xff] %v1345_v42  ;;  %1469 = vst [vmem:[%s2661_s4 + $0x140] sm:$0xff] %v1313_v3 }
 0x266   :  { %v1346_v11 = vpop.trf.xlu1  ;;  %v1314_v54 = vpop.trf.xlu0 }
 0x267   :  { %1472 = vst [vmem:[%s2661_s4 + $0x158] sm:$0xff] %v1346_v11  ;;  %1471 = vst [vmem:[%s2661_s4 + $0x150] sm:$0xff] %v1314_v54 }
 0x26a   :  { %v1347_v46 = vpop.trf.xlu1  ;;  %v1315_v62 = vpop.trf.xlu0 }
 0x26b   :  { %1474 = vst [vmem:[%s2661_s4 + $0x168] sm:$0xff] %v1347_v46  ;;  %1473 = vst [vmem:[%s2661_s4 + $0x160] sm:$0xff] %v1315_v62 }
 0x26e   :  { %v1348_v1 = vpop.trf.xlu1  ;;  %v1316_v47 = vpop.trf.xlu0 }
 0x26f   :  { %1476 = vst [vmem:[%s2661_s4 + $0x178] sm:$0xff] %v1348_v1  ;;  %1475 = vst [vmem:[%s2661_s4 + $0x170] sm:$0xff] %v1316_v47 }
 0x272   :  { %v1349_v43 = vpop.trf.xlu1  ;;  %v1317_v59 = vpop.trf.xlu0 }
 0x273   :  { %1478 = vst [vmem:[%s2661_s4 + $0x188] sm:$0xff] %v1349_v43  ;;  %1477 = vst [vmem:[%s2661_s4 + $0x180] sm:$0xff] %v1317_v59 }
 0x276   :  { %v1350_v22 = vpop.trf.xlu1  ;;  %v1318_v50 = vpop.trf.xlu0 }
 0x277   :  { %1480 = vst [vmem:[%s2661_s4 + $0x198] sm:$0xff] %v1350_v22  ;;  %1479 = vst [vmem:[%s2661_s4 + $0x190] sm:$0xff] %v1318_v50 }
 0x27a   :  { %v1351_v41 = vpop.trf.xlu1  ;;  %v1319_v57 = vpop.trf.xlu0 }
 0x27b   :  { %1482 = vst [vmem:[%s2661_s4 + $0x1a8] sm:$0xff] %v1351_v41  ;;  %1481 = vst [vmem:[%s2661_s4 + $0x1a0] sm:$0xff] %v1319_v57 }
 0x27e   :  { %v1352_v8 = vpop.trf.xlu1  ;;  %v1320_v16 = vpop.trf.xlu0 }
 0x27f   :  { %1484 = vst [vmem:[%s2661_s4 + $0x1b8] sm:$0xff] %v1352_v8  ;;  %1483 = vst [vmem:[%s2661_s4 + $0x1b0] sm:$0xff] %v1320_v16 }
 0x282   :  { %v1353_v15 = vpop.trf.xlu1  ;;  %v1321_v31 = vpop.trf.xlu0 }
 0x283   :  { %1486 = vst [vmem:[%s2661_s4 + $0x1c8] sm:$0xff] %v1353_v15  ;;  %1485 = vst [vmem:[%s2661_s4 + $0x1c0] sm:$0xff] %v1321_v31 }
 0x286   :  { %v1354_v6 = vpop.trf.xlu1  ;;  %v1322_v10 = vpop.trf.xlu0 }
 0x287   :  { %1488 = vst [vmem:[%s2661_s4 + $0x1d8] sm:$0xff] %v1354_v6  ;;  %1487 = vst [vmem:[%s2661_s4 + $0x1d0] sm:$0xff] %v1322_v10 }
 0x28a   :  { %v1355_v27 = vpop.trf.xlu1  ;;  %v1323_v13 = vpop.trf.xlu0 }
 0x28b   :  { %1490 = vst [vmem:[%s2661_s4 + $0x1e8] sm:$0xff] %v1355_v27  ;;  %1489 = vst [vmem:[%s2661_s4 + $0x1e0] sm:$0xff] %v1323_v13 }
 0x28e   :  { %v1356_v28 = vpop.trf.xlu1  ;;  %v1324_v35 = vpop.trf.xlu0 }
 0x28f   :  { %1492 = vst [vmem:[%s2661_s4 + $0x1f8] sm:$0xff] %v1356_v28  ;;  %1491 = vst [vmem:[%s2661_s4 + $0x1f0] sm:$0xff] %v1324_v35 }

</bundles_post_ra>
